<compile_context>
chip_gen: v7x
topology: tpu7x:2x2x1
jax: 0.10.0
libtpu: 0.0.40
codegen_flags: <defaults>
</compile_context>

<pallas_src>
import jax
import jax.numpy as jnp
from jax.experimental import pallas as pl
from jax.experimental.pallas import tpu as pltpu

EPS = 1e-5  # torch.nn.LayerNorm default eps


def _round_up(x, m):
    return ((x + m - 1) // m) * m


def _layernorm_f32(y):
    # two-pass variance ((y - mu)^2 mean): robust even for large-mean rows.
    mu = jnp.mean(y, axis=-1, keepdims=True)
    yc = y - mu
    var = jnp.mean(yc * yc, axis=-1, keepdims=True)
    return yc * jax.lax.rsqrt(var + EPS)


# ----------------------------------------------------------------------------
# Pallas kernels
# ----------------------------------------------------------------------------
def _proj_ln_kernel(x_ref, w_ref, b_ref, g_ref, beta_ref, o_ref):
    # embedding_proj (g > 1): y = LayerNorm(x @ W + b); bf16 out, f32 stats.
    y = jnp.dot(x_ref[...], w_ref[...], preferred_element_type=jnp.float32)
    y = y + b_ref[...]
    yn = _layernorm_f32(y) * g_ref[...] + beta_ref[...]
    o_ref[...] = yn.astype(o_ref.dtype)


def _heads_logits_emb_kernel(h_ref, hw_ref, hb_ref, lg_ref, lb_ref,
                             ew_ref, eb_ref, emb_ref, log_ref):
    # Fused per-gq: head projection -> (bf16) embeds tile, LayerNorm, EinMix
    # matmul against ein_w[gq] -> logits tile.  MXU operands bf16, acc f32.
    y = jnp.dot(h_ref[...], hw_ref[...], preferred_element_type=jnp.float32)
    y = y + hb_ref[0]
    emb_ref[...] = y.astype(emb_ref.dtype)          # bf16 writeback
    yn = _layernorm_f32(y) * lg_ref[...] + lb_ref[...]
    log_ref[...] = (
        jnp.dot(yn.astype(ew_ref.dtype), ew_ref[0],
                preferred_element_type=jnp.float32)
        + eb_ref[0]
    )


def _heads_logits_kernel(h_ref, hw_ref, hb_ref, lg_ref, lb_ref,
                         ew_ref, eb_ref, log_ref):
    # Logits-only fused variant: no embeds HBM writeback.
    y = jnp.dot(h_ref[...], hw_ref[...], preferred_element_type=jnp.float32)
    y = y + hb_ref[0]
    yn = _layernorm_f32(y) * lg_ref[...] + lb_ref[...]
    log_ref[...] = (
        jnp.dot(yn.astype(ew_ref.dtype), ew_ref[0],
                preferred_element_type=jnp.float32)
        + eb_ref[0]
    )


def _heads_kernel(h_ref, hw_ref, hb_ref, emb_ref):
    y = jnp.dot(h_ref[...], hw_ref[...], preferred_element_type=jnp.float32)
    emb_ref[...] = (y + hb_ref[0]).astype(emb_ref.dtype)


# ----------------------------------------------------------------------------
# pallas_call wrappers
# ----------------------------------------------------------------------------
def proj_layernorm(x_bf, w_bf, b_r, g_r, beta_r, *, tm, vmem_limit):
    Mp, din = x_bf.shape
    d = w_bf.shape[1]
    cost = pl.CostEstimate(
        flops=int(2 * Mp * din * d),
        transcendentals=int(Mp),
        bytes_accessed=int(Mp * din * 2 + din * d * 2 + Mp * d * 2 + 3 * d * 4),
    )
    return pl.pallas_call(
        _proj_ln_kernel,
        out_shape=jax.ShapeDtypeStruct((Mp, d), jnp.bfloat16),
        grid=(Mp // tm,),
        in_specs=[
            pl.BlockSpec((tm, din), lambda m: (m, 0)),
            pl.BlockSpec((din, d), lambda m: (0, 0)),
            pl.BlockSpec((1, d), lambda m: (0, 0)),
            pl.BlockSpec((1, d), lambda m: (0, 0)),
            pl.BlockSpec((1, d), lambda m: (0, 0)),
        ],
        out_specs=pl.BlockSpec((tm, d), lambda m: (m, 0)),
        compiler_params=pltpu.CompilerParams(
            dimension_semantics=("parallel",),
            vmem_limit_bytes=int(vmem_limit),
        ),
        cost_estimate=cost,
    )(x_bf, w_bf, b_r, g_r, beta_r)


def heads_fused(h_bf, heads_w_bf, heads_b_r, lg_r, lb_r, ein_w_bf, ein_b_r,
                *, tm, vmem_limit, with_embeds):
    Mp, d = h_bf.shape
    gq, _, lp = ein_w_bf.shape
    flops = 2 * Mp * d * gq * d + 2 * Mp * d * gq * lp
    bytes_io = (gq * Mp * d * 2 + d * gq * d * 2 + gq * d * lp * 2
                + Mp * gq * lp * 4)
    log_sds = jax.ShapeDtypeStruct((Mp, gq * lp), jnp.float32)
    log_spec = pl.BlockSpec((tm, lp), lambda h, m: (m, h))
    if with_embeds:
        bytes_io += Mp * gq * d * 2
        out_shape = (jax.ShapeDtypeStruct((Mp, gq * d), jnp.bfloat16), log_sds)
        out_specs = (pl.BlockSpec((tm, d), lambda h, m: (m, h)), log_spec)
        kernel = _heads_logits_emb_kernel
    else:
        out_shape = log_sds
        out_specs = log_spec
        kernel = _heads_logits_kernel
    cost = pl.CostEstimate(flops=int(flops), transcendentals=int(Mp * gq),
                           bytes_accessed=int(bytes_io))
    return pl.pallas_call(
        kernel,
        out_shape=out_shape,
        # gq outer / M-tiles inner: weight blocks stay VMEM-resident per gq,
        # the activation tile streams.
        grid=(gq, Mp // tm),
        in_specs=[
            pl.BlockSpec((tm, d), lambda h, m: (m, 0)),        # activations
            pl.BlockSpec((d, d), lambda h, m: (0, h)),         # heads_w[:, h]
            pl.BlockSpec((1, 1, d), lambda h, m: (h, 0, 0)),   # heads_b[h]
            pl.BlockSpec((1, d), lambda h, m: (0, 0)),         # LN gamma
            pl.BlockSpec((1, d), lambda h, m: (0, 0)),         # LN beta
            pl.BlockSpec((1, d, lp), lambda h, m: (h, 0, 0)),  # ein_w[h]
            pl.BlockSpec((1, 1, lp), lambda h, m: (h, 0, 0)),  # ein_b[h]
        ],
        out_specs=out_specs,
        compiler_params=pltpu.CompilerParams(
            dimension_semantics=("parallel", "parallel"),
            vmem_limit_bytes=int(vmem_limit),
        ),
        cost_estimate=cost,
    )(h_bf, heads_w_bf, heads_b_r, lg_r, lb_r, ein_w_bf, ein_b_r)


def heads_only(h_bf, heads_w_bf, heads_b_r, *, tm, vmem_limit):
    Mp, d = h_bf.shape
    gq = heads_b_r.shape[0]
    cost = pl.CostEstimate(
        flops=int(2 * Mp * d * gq * d),
        transcendentals=0,
        bytes_accessed=int(gq * Mp * d * 2 + d * gq * d * 2 + Mp * gq * d * 2),
    )
    return pl.pallas_call(
        _heads_kernel,
        out_shape=jax.ShapeDtypeStruct((Mp, gq * d), jnp.bfloat16),
        grid=(gq, Mp // tm),
        in_specs=[
            pl.BlockSpec((tm, d), lambda h, m: (m, 0)),
            pl.BlockSpec((d, d), lambda h, m: (0, h)),
            pl.BlockSpec((1, 1, d), lambda h, m: (h, 0, 0)),
        ],
        out_specs=pl.BlockSpec((tm, d), lambda h, m: (m, h)),
        compiler_params=pltpu.CompilerParams(
            dimension_semantics=("parallel", "parallel"),
            vmem_limit_bytes=int(vmem_limit),
        ),
        cost_estimate=cost,
    )(h_bf, heads_w_bf, heads_b_r)


# ----------------------------------------------------------------------------
# Module wrapper (parameter setup + glue in plain JAX)
# ----------------------------------------------------------------------------
class BackboneWrapperPallas:
    def __init__(self, key, *, codebook_size, num_quantizers, dim,
                 grouped_quantizers=1):
        assert dim % 128 == 0, "Pallas kernels assume dim is a multiple of 128"
        self.dim = dim
        self.codebook_size = codebook_size
        self.num_quantizers = num_quantizers
        self.grouped_quantizers = grouped_quantizers
        self.num_codes_with_mask = codebook_size + 1
        gq = num_quantizers * grouped_quantizers
        self.gq = gq
        self.Lp = _round_up(codebook_size, 128)   # lane-padded logits width

        ks = jax.random.split(key, 10)
        f32 = jnp.float32

        # nn.Embedding(num_codes_with_mask * gq, dim)
        self.code_embeds = 0.05 * jax.random.normal(
            ks[0], (self.num_codes_with_mask * gq, dim), f32)
        self.quantizer_offsets = (
            jnp.arange(gq, dtype=jnp.int32) * self.num_codes_with_mask)
        self.mask_tokens = self.quantizer_offsets + self.num_codes_with_mask

        # embedding_proj = Linear(dim*g, dim) + LayerNorm(dim)  (if g > 1)
        if grouped_quantizers > 1:
            self.proj_w = 0.05 * jax.random.normal(
                ks[1], (dim * grouped_quantizers, dim), f32)
            self.proj_b = 0.05 * jax.random.normal(ks[2], (dim,), f32)
            self.proj_g = 1.0 + 0.1 * jax.random.normal(ks[3], (dim,), f32)
            self.proj_beta = 0.1 * jax.random.normal(ks[4], (dim,), f32)

        # heads = Linear(dim, dim * gq)
        self.heads_w = 0.05 * jax.random.normal(ks[5], (dim, dim * gq), f32)
        self.heads_b = 0.05 * jax.random.normal(ks[6], (dim * gq,), f32)

        # to_logits = LayerNorm(dim) + EinMix(weight 'gq d l', bias 'gq l')
        self.lg = 1.0 + 0.1 * jax.random.normal(ks[7], (dim,), f32)
        self.lb = 0.1 * jax.random.normal(ks[8], (dim,), f32)
        kw, kb = jax.random.split(ks[9])
        self.ein_w = 0.05 * jax.random.normal(kw, (gq, dim, codebook_size), f32)
        self.ein_b = 0.05 * jax.random.normal(kb, (gq, codebook_size), f32)

        # --- kernel-side parameter copies (bf16 MXU operands, padded L) ---
        pad_l = self.Lp - codebook_size
        self.code_embeds_bf = self.code_embeds.astype(jnp.bfloat16)
        self.heads_w_bf = self.heads_w.astype(jnp.bfloat16)
        self.heads_b_r = self.heads_b.reshape(gq, 1, dim)
        if grouped_quantizers > 1:
            self.proj_w_bf = self.proj_w.astype(jnp.bfloat16)
            self.proj_b_r = self.proj_b.reshape(1, dim)
            self.proj_g_r = self.proj_g.reshape(1, dim)
            self.proj_beta_r = self.proj_beta.reshape(1, dim)
        self.lg_r = self.lg.reshape(1, dim)
        self.lb_r = self.lb.reshape(1, dim)
        ein_w_p = jnp.pad(self.ein_w, ((0, 0), (0, 0), (0, pad_l)))
        ein_b_p = jnp.pad(self.ein_b, ((0, 0), (0, pad_l)))
        self.ein_w_bf = ein_w_p.astype(jnp.bfloat16)
        self.ein_b_r = ein_b_p.reshape(gq, 1, self.Lp)

    # ------------------------------------------------------------------
    def _plan_tiles(self, M):
        """Generation-aware M-tile + scoped-VMEM budget."""
        d, gq, Lp, g = self.dim, self.gq, self.Lp, self.grouped_quantizers
        try:
            info = pltpu.get_tpu_info()
            cap = getattr(info, "vmem_capacity_bytes", None)
            cap = int(cap) if cap else (64 << 20)
        except Exception:                       # CPU interpret / old jax
            cap = 64 << 20
        vmem_limit = min((cap * 3) // 4, 112 << 20)   # ~48 MiB v7x, ~96 MiB v5e/v6e
        target = 512 if cap >= (100 << 20) else 256
        tm = min(target, _round_up(M, 16))            # bf16: 16-row sublane packs

        def footprint(t):
            # double-buffered per-step bytes of the fused heads+logits kernel
            f = 2 * (t * d * 2 + d * d * 2 + d * 2 + 2 * d * 4
                     + d * Lp * 2 + Lp * 4)
            f += 2 * (t * d * 2 + t * Lp * 4)
            if g > 1:                                  # proj kernel footprint
                din = g * d
                p = 2 * (t * din * 2 + din * d * 2 + 3 * d * 4) + 2 * t * d * 2
                f = max(f, p)
            return f

        while tm > 64 and footprint(tm) > vmem_limit - (4 << 20):
            tm = _round_up(max(64, tm // 2), 16)
        Mp = _round_up(M, tm)
        return tm, Mp, int(vmem_limit)

    # ------------------------------------------------------------------
    def _finalize_logits(self, l2d, b, n, M):
        L, Lp, gq = self.codebook_size, self.Lp, self.gq
        if l2d.shape[0] != M:
            l2d = l2d[:M]
        logits = l2d.reshape(b, n, gq, Lp)
        if Lp != L:
            # TODO(synk): consumers could take Lp-padded logits + a lane mask
            # to avoid this narrowing copy.
            logits = logits[..., :L]
        return logits.reshape(b, n * gq, L)

    # ------------------------------------------------------------------
    def forward(self, x, *, mask=None, cond=None, sum_embeds=None,
                return_embeddings=False, return_logits_and_embeddings=False):
        b, N = x.shape
        g, q, d = self.grouped_quantizers, self.num_quantizers, self.dim
        gq = self.gq
        assert N % gq == 0, "sequence must be divisible by number of quantizers"
        n = N // gq
        M = b * n

        # 'b (n gq) -> b n gq', add per-quantizer offset, embed (bf16 table),
        # sum over q (f32 accumulate).
        # TODO(synk): gather + sum-over-q left to XLA; could be fused into a
        # Pallas kernel (PrefetchScalarGridSpec + per-row DMA gather).
        tok = x.reshape(b, n, gq) + self.quantizer_offsets
        emb = jnp.take(self.code_embeds_bf, tok, axis=0)        # (b,n,gq,d) bf16
        emb = emb.reshape(b, n, g, q, d).sum(axis=3, dtype=jnp.float32)
        emb = emb.reshape(M, g * d).astype(jnp.bfloat16)

        tm, Mp, vmem_limit = self._plan_tiles(M)
        if Mp != M:                                    # pad ONCE up front
            emb = jnp.pad(emb, ((0, Mp - M), (0, 0)))

        if g > 1:
            h_bf = proj_layernorm(emb, self.proj_w_bf, self.proj_b_r,
                                  self.proj_g_r, self.proj_beta_r,
                                  tm=tm, vmem_limit=vmem_limit)
        else:
            h_bf = emb                                 # Identity

        if sum_embeds is not None or cond is not None:
            add = jnp.zeros((b, n, d), jnp.float32)
            if sum_embeds is not None:
                add = add + sum_embeds
            if cond is not None:
                if cond.ndim == 2:
                    cond = cond[:, None, :]
                add = add + cond
            add = add.reshape(M, d).astype(jnp.bfloat16)
            if Mp != M:
                add = jnp.pad(add, ((0, Mp - M), (0, 0)))
            h_bf = h_bf + add

        # TODO(synk): external backbone `self.net` (NET_NAME_DICT[backbone_type])
        # is not defined in this module; treated as identity (mask unused).

        if return_embeddings:
            e2d = heads_only(h_bf, self.heads_w_bf, self.heads_b_r,
                             tm=tm, vmem_limit=vmem_limit)
            return e2d[:M].reshape(b, n * gq, d)

        if return_logits_and_embeddings:
            e2d, l2d = heads_fused(h_bf, self.heads_w_bf, self.heads_b_r,
                                   self.lg_r, self.lb_r,
                                   self.ein_w_bf, self.ein_b_r,
                                   tm=tm, vmem_limit=vmem_limit,
                                   with_embeds=True)
            embeds = e2d[:M].reshape(b, n * gq, d)
            logits = self._finalize_logits(l2d, b, n, M)
            return logits, embeds

        # common path: logits only, no embeds HBM writeback at all
        l2d = heads_fused(h_bf, self.heads_w_bf, self.heads_b_r,
                          self.lg_r, self.lb_r,
                          self.ein_w_bf, self.ein_b_r,
                          tm=tm, vmem_limit=vmem_limit, with_embeds=False)
        return self._finalize_logits(l2d, b, n, M)


# ----------------------------------------------------------------------------
# Pure-JAX f32 reference (numerical verification)
# ----------------------------------------------------------------------------
def ref_forward(m, x):
    b, N = x.shape
    g, q, d, gq = m.grouped_quantizers, m.num_quantizers, m.dim, m.gq
    n = N // gq
    tok = x.reshape(b, n, gq) + m.quantizer_offsets
    emb = jnp.take(m.code_embeds, tok, axis=0)
    emb = emb.reshape(b, n, g, q, d).sum(axis=3).reshape(b, n, g * d)
    if g > 1:
        y = emb @ m.proj_w + m.proj_b
        mu = y.mean(-1, keepdims=True)
        var = ((y - mu) ** 2).mean(-1, keepdims=True)
        h = (y - mu) * jax.lax.rsqrt(var + EPS) * m.proj_g + m.proj_beta
    else:
        h = emb
    e = h @ m.heads_w + m.heads_b
    embeds = e.reshape(b, n, gq, d).reshape(b, n * gq, d)
    mu = embeds.mean(-1, keepdims=True)
    var = ((embeds - mu) ** 2).mean(-1, keepdims=True)
    xn = (embeds - mu) * jax.lax.rsqrt(var + EPS) * m.lg + m.lb
    xn = xn.reshape(b, n, gq, d)
    logits = jnp.einsum("bngd,gdl->bngl", xn, m.ein_w) + m.ein_b
    return logits.reshape(b, n * gq, m.codebook_size), embeds


# ----------------------------------------------------------------------------
if __name__ == "__main__":
    key = jax.random.PRNGKey(0)
    k_param, k_tok = jax.random.split(key)

    # small shapes: batch=2, n=8 positions, 2 quantizers x 2 groups (gq=4),
    # dim=128, codebook_size=128  ->  token sequence length N = 8*4 = 32
    codebook_size = 128
    num_quantizers = 2
    grouped_quantizers = 2
    dim = 128
    batch, n = 2, 8
    gq = num_quantizers * grouped_quantizers

    model = BackboneWrapperPallas(
        k_param,
        codebook_size=codebook_size,
        num_quantizers=num_quantizers,
        dim=dim,
        grouped_quantizers=grouped_quantizers,
    )

    x = jax.random.randint(k_tok, (batch, n * gq), 0, codebook_size,
                           dtype=jnp.int32)

    # path 1: logits + embeds (fused kernel with bf16 embeds writeback)
    logits, embeds = model.forward(x, return_logits_and_embeddings=True)
    logits = jax.block_until_ready(logits)
    embeds = jax.block_until_ready(embeds)
    assert logits.shape == (batch, n * gq, codebook_size), logits.shape
    assert embeds.shape == (batch, n * gq, dim), embeds.shape

    # path 2: common logits-only path (no embeds writeback)
    logits_only = jax.block_until_ready(model.forward(x))
    assert logits_only.shape == (batch, n * gq, codebook_size)

    # path 3: embeds-only path
    embeds_only = jax.block_until_ready(
        model.forward(x, return_embeddings=True))
    assert embeds_only.shape == (batch, n * gq, dim)

    ref_logits, ref_embeds = ref_forward(model, x)

    def rel_err(a, b):
        a = a.astype(jnp.float32)
        return float(jnp.linalg.norm(a - b) / (jnp.linalg.norm(b) + 1e-12))

    errs = {
        "embeds": rel_err(embeds, ref_embeds),
        "logits": rel_err(logits, ref_logits),
        "logits_only": rel_err(logits_only, ref_logits),
        "embeds_only": rel_err(embeds_only, ref_embeds),
    }
    # bf16 MXU operands / bf16 table+activations with f32 accumulation:
    # expect ~0.5-2% relative error.
    for name, e in errs.items():
        assert e < 4e-2, f"{name} rel err too high: {e}"

    print("KERNEL_OK")
</pallas_src>

<mosaic_0001>
module attributes {stable_mosaic.version = 11 : i64} {
  func.func @_proj_ln_kernel(%arg0: i32, %arg1: memref<16x256xbf16, #tpu.memory_space<vmem>>, %arg2: memref<256x128xbf16, #tpu.memory_space<vmem>>, %arg3: memref<1x128xf32, #tpu.memory_space<vmem>>, %arg4: memref<1x128xf32, #tpu.memory_space<vmem>>, %arg5: memref<1x128xf32, #tpu.memory_space<vmem>>, %arg6: memref<16x128xbf16, #tpu.memory_space<vmem>>) attributes {dimension_semantics = [#tpu.dimension_semantics<parallel>], iteration_bounds = array<i64: 1>, scalar_prefetch = 0 : i64, scratch_operands = 0 : i64, tpu.core_type = #tpu.core_type<tc>, window_params = [{transform_indices = @transform_0, window_bounds = array<i64: 16, 256>}, {pipeline_mode = #tpu.pipeline_mode<synchronous>, transform_indices = @transform_1, window_bounds = array<i64: 256, 128>}, {pipeline_mode = #tpu.pipeline_mode<synchronous>, transform_indices = @transform_2, window_bounds = array<i64: 1, 128>}, {pipeline_mode = #tpu.pipeline_mode<synchronous>, transform_indices = @transform_3, window_bounds = array<i64: 1, 128>}, {pipeline_mode = #tpu.pipeline_mode<synchronous>, transform_indices = @transform_4, window_bounds = array<i64: 1, 128>}, {transform_indices = @transform_5, window_bounds = array<i64: 16, 128>}]} {
    %c0 = arith.constant 0 : index
    %c0_0 = arith.constant 0 : index
    %0 = vector.load %arg1[%c0, %c0_0] : memref<16x256xbf16, #tpu.memory_space<vmem>>, vector<16x256xbf16>
    %c0_1 = arith.constant 0 : index
    %c0_2 = arith.constant 0 : index
    %1 = vector.load %arg2[%c0_1, %c0_2] : memref<256x128xbf16, #tpu.memory_space<vmem>>, vector<256x128xbf16>
    %cst = arith.constant dense<0.000000e+00> : vector<16x128xf32>
    %2 = tpu.matmul %0, %1, %cst {dimension_numbers = #tpu.dot_dimension_numbers<[1], [0], [0], [1], [0, 0, 1, 1], [], []>} : vector<16x256xbf16>, vector<256x128xbf16>, vector<16x128xf32> -> vector<16x128xf32>
    %c0_3 = arith.constant 0 : index
    %c0_4 = arith.constant 0 : index
    %3 = vector.load %arg3[%c0_3, %c0_4] : memref<1x128xf32, #tpu.memory_space<vmem>>, vector<1x128xf32>
    %4 = vector.broadcast %3 : vector<1x128xf32> to vector<16x128xf32>
    %5 = arith.addf %2, %4 : vector<16x128xf32>
    %cst_5 = arith.constant dense<0.000000e+00> : vector<16xf32>
    %6 = vector.multi_reduction <add>, %5, %cst_5 [1] : vector<16x128xf32> to vector<16xf32>
    %7 = vector.shape_cast %6 : vector<16xf32> to vector<16x1xf32>
    %cst_6 = arith.constant 1.280000e+02 : f32
    %8 = vector.broadcast %cst_6 : f32 to vector<16x1xf32>
    %9 = arith.divf %7, %8 : vector<16x1xf32>
    %10 = vector.broadcast %9 : vector<16x1xf32> to vector<16x128xf32>
    %11 = arith.subf %5, %10 : vector<16x128xf32>
    %12 = arith.mulf %11, %11 : vector<16x128xf32>
    %cst_7 = arith.constant dense<0.000000e+00> : vector<16xf32>
    %13 = vector.multi_reduction <add>, %12, %cst_7 [1] : vector<16x128xf32> to vector<16xf32>
    %14 = vector.shape_cast %13 : vector<16xf32> to vector<16x1xf32>
    %cst_8 = arith.constant 1.280000e+02 : f32
    %15 = vector.broadcast %cst_8 : f32 to vector<16x1xf32>
    %16 = arith.divf %14, %15 : vector<16x1xf32>
    %cst_9 = arith.constant 9.99999974E-6 : f32
    %17 = vector.broadcast %cst_9 : f32 to vector<16x1xf32>
    %18 = arith.addf %16, %17 : vector<16x1xf32>
    %19 = math.rsqrt %18 : vector<16x1xf32>
    %20 = vector.broadcast %19 : vector<16x1xf32> to vector<16x128xf32>
    %21 = arith.mulf %11, %20 : vector<16x128xf32>
    %c0_10 = arith.constant 0 : index
    %c0_11 = arith.constant 0 : index
    %22 = vector.load %arg4[%c0_10, %c0_11] : memref<1x128xf32, #tpu.memory_space<vmem>>, vector<1x128xf32>
    %23 = vector.broadcast %22 : vector<1x128xf32> to vector<16x128xf32>
    %24 = arith.mulf %21, %23 : vector<16x128xf32>
    %c0_12 = arith.constant 0 : index
    %c0_13 = arith.constant 0 : index
    %25 = vector.load %arg5[%c0_12, %c0_13] : memref<1x128xf32, #tpu.memory_space<vmem>>, vector<1x128xf32>
    %26 = vector.broadcast %25 : vector<1x128xf32> to vector<16x128xf32>
    %27 = arith.addf %24, %26 : vector<16x128xf32>
    %28 = arith.truncf %27 : vector<16x128xf32> to vector<16x128xbf16>
    %c0_14 = arith.constant 0 : index
    %c0_15 = arith.constant 0 : index
    %29 = vector.load %arg6[%c0_14, %c0_15] : memref<16x128xbf16, #tpu.memory_space<vmem>>, vector<16x128xbf16>
    tpu.vector_store %arg6[%c0_14, %c0_15], %28 {strides = array<i32>} : memref<16x128xbf16, #tpu.memory_space<vmem>>, vector<16x128xbf16>,
    return
  }
  func.func @transform_0(%arg0: i32) -> (i32, i32) {
    %c0_i32 = arith.constant 0 : i32
    %c0_i32_0 = arith.constant 0 : i32
    return %arg0, %c0_i32 : i32, i32
  }
  func.func @transform_1(%arg0: i32) -> (i32, i32) {
    %c0_i32 = arith.constant 0 : i32
    %c0_i32_0 = arith.constant 0 : i32
    %c0_i32_1 = arith.constant 0 : i32
    return %c0_i32, %c0_i32_0 : i32, i32
  }
  func.func @transform_2(%arg0: i32) -> (i32, i32) {
    %c0_i32 = arith.constant 0 : i32
    %c0_i32_0 = arith.constant 0 : i32
    %c0_i32_1 = arith.constant 0 : i32
    return %c0_i32, %c0_i32_0 : i32, i32
  }
  func.func @transform_3(%arg0: i32) -> (i32, i32) {
    %c0_i32 = arith.constant 0 : i32
    %c0_i32_0 = arith.constant 0 : i32
    %c0_i32_1 = arith.constant 0 : i32
    return %c0_i32, %c0_i32_0 : i32, i32
  }
  func.func @transform_4(%arg0: i32) -> (i32, i32) {
    %c0_i32 = arith.constant 0 : i32
    %c0_i32_0 = arith.constant 0 : i32
    %c0_i32_1 = arith.constant 0 : i32
    return %c0_i32, %c0_i32_0 : i32, i32
  }
  func.func @transform_5(%arg0: i32) -> (i32, i32) {
    %c0_i32 = arith.constant 0 : i32
    %c0_i32_0 = arith.constant 0 : i32
    return %arg0, %c0_i32 : i32, i32
  }
}

</mosaic_0001>

<bundles_post_ra>
// kernel: tpu_custom_call.1
= control target key start
LH: loop header
LB: loop body
LE: loop exit
PB: predicated region body
PF: predicated region fallthrough
CT: control target
= control target key end

     0   :  { %10 = vsyncpa [#allocation3], 0  ;;  %s549_s0 = inlined_call_operand.hbm [shape: bf16[16,256], index: 0, kind: input, shape index: {}]   ;;  %s550_s1 = inlined_call_operand.hbm [shape: bf16[256,128], index: 1, kind: input, shape index: {}]   ;;  %s551_s2 = inlined_call_operand.vmem [shape: f32[1,128], index: 2, kind: input, shape index: {}]   ;;  %s552_s3 = inlined_call_operand.vmem [shape: f32[1,128], index: 3, kind: input, shape index: {}]   ;;  %s553_s4 = inlined_call_operand.vmem [shape: f32[1,128], index: 4, kind: input, shape index: {}]   ;;  %s554_s5 = inlined_call_operand.hbm [shape: bf16[16,128], index: 5, kind: output, shape index: {}]  }
   0x1   :  { %11 = vsyncpa [#allocation6], 0 }
   0x2   :  { %12 = vsyncpa [#allocation4], 0  ;;  %s461_s18 = smov [#allocation2]   ;;  %s389_s22 = scalar_lea.hbm %s549_s0, 256 }
   0x3   :  { %s18_s19 = sshll.u32 %s461_s18, 4  ;;  %p390_p0 = scmp.ne.s32.totalorder %s549_s0, %s389_s22  ;;  %s19_s19 = int_to_ptr.vmem [resolvable:$true] %s18_s19 }
   0x4   :  { %p393_p1 = scmp.lt.u32.totalorder %s389_s22, %s549_s0 }
   0x6   :  { %p395_p2 = pnand %p393_p1, %p390_p0 }
   0x8   :  { %398 = shalt.err (!%p395_p2)
}
   0x9   :  { %s399_s27 = scalar_lea.vmem %s19_s19, 256  ;;  %p404_p4 = scmp.lt.s32.totalorder %s19_s19, %s19_s19 }
   0xa   :  { %p400_p3 = scmp.ne.s32.totalorder %s19_s19, %s399_s27  ;;  %p405_p5 = scmp.lt.s32.totalorder %s399_s27, %s399_s27 }
   0xc   :  { %p406_p6 = por %p405_p5, %p404_p4 }
   0xe   :  { %p407_p7 = pnand %p406_p6, %p400_p3 }
  0x10   :  { %410 = shalt.err (!%p407_p7)
}
  0x11   :  { %s462_s28 = smov 128   ;;  %s463_s29 = smov 8  }
  0x12   :  { %24 = dma.hbm_to_vmem [thread:$0]  %s549_s0, 256, %s19_s19, [#allocation3], %s462_s28, %s462_s28, %s463_s29  }
  0x13   :  { %s464_s7 = smov [#allocation5]   ;;  %s411_s11 = scalar_lea.hbm %s550_s1, 2048 }
  0x14   :  { %s30_s8 = sshll.u32 %s464_s7, 4  ;;  %p412_p8 = scmp.ne.s32.totalorder %s550_s1, %s411_s11  ;;  %s31_s8 = int_to_ptr.vmem [resolvable:$true] %s30_s8 }
  0x15   :  { %p415_p9 = scmp.lt.u32.totalorder %s411_s11, %s550_s1 }
  0x17   :  { %p417_p10 = pnand %p415_p9, %p412_p8 }
  0x19   :  { %420 = shalt.err (!%p417_p10)
}
  0x1a   :  { %s421_s16 = scalar_lea.vmem %s31_s8, 2048  ;;  %p426_p12 = scmp.lt.s32.totalorder %s31_s8, %s31_s8 }
  0x1b   :  { %p422_p11 = scmp.ne.s32.totalorder %s31_s8, %s421_s16  ;;  %p427_p13 = scmp.lt.s32.totalorder %s421_s16, %s421_s16 }
  0x1d   :  { %p428_p0 = por %p427_p13, %p426_p12 }
  0x1f   :  { %p429_p1 = pnand %p428_p0, %p422_p11 }
  0x21   :  { %432 = shalt.err (!%p429_p1)
}
  0x22   :  { %s465_s0 = smov 64   ;;  %s466_s17 = smov 4  }
  0x23   :  { %36 = dma.hbm_to_vmem [thread:$0]  %s550_s1, 2048, %s31_s8, [#allocation6], %s465_s0, %s465_s0, %s466_s17  }
  0x24   :  { %455 = dma.done.wait [#allocation3], 256  }
  0x25   :  { %456 = vsyncadd [#allocation3], 4294967040 }
  0x26   :  { %457 = dma.done.wait [#allocation6], 2048  }
  0x27   :  { %458 = vsyncadd [#allocation6], 4294965248  ;;  %v366_v0 = vld [vmem:[#allocation5 + $0x40] sm:$0xff]   ;;  %v368_v2 = vld [vmem:[#allocation5 + $0x48] sm:$0xff]   ;;  %s467_s24 = smov [#allocation7]  }
  0x28   :  { %v367_v1 = vld [vmem:[#allocation5] sm:$0xff]   ;;  %337 = vmatprep.subr.bf16.mxu0 %v366_v0  ;;  %v369_v3 = vld [vmem:[#allocation5 + $0x8] sm:$0xff]   ;;  %v370_v4 = vld [vmem:[#allocation5 + $0x50] sm:$0xff]   ;;  %s294_s25 = sshll.u32 %s467_s24, 4  ;;  %s295_s25 = int_to_ptr.vmem [resolvable:$true] %s294_s25 }
  0x29   :  { %338 = vmatpush3.bf16.msra.mxu0 %v367_v1  ;;  %v371_v5 = vld [vmem:[#allocation5 + $0x10] sm:$0xff]   ;;  %v372_v6 = vld [vmem:[#allocation5 + $0x58] sm:$0xff]   ;;  %v374_v8 = vld [vmem:[#allocation5 + $0x60] sm:$0xff]   ;;  %s433_s26 = scalar_lea.vmem %s295_s25, 128  ;;  %p438_p3 = scmp.lt.s32.totalorder %s295_s25, %s295_s25 }
  0x2a   :  { %339 = vmatprep.subr.bf16.mxu0 %v368_v2  ;;  %v373_v7 = vld [vmem:[#allocation5 + $0x18] sm:$0xff]   ;;  %v375_v9 = vld [vmem:[#allocation5 + $0x20] sm:$0xff]   ;;  %v376_v10 = vld [vmem:[#allocation5 + $0x68] sm:$0xff]   ;;  %p434_p2 = scmp.ne.s32.totalorder %s295_s25, %s433_s26  ;;  %p439_p4 = scmp.lt.s32.totalorder %s433_s26, %s433_s26 }
  0x2b   :  { %v384_v11 = vld [vmem:[#allocation2 + $0x4] ss:$8 sps:$4 sm:$0xff]   ;;  %v377_v12 = vld [vmem:[#allocation5 + $0x28] sm:$0xff]   ;;  %v382_v17 = vld [vmem:[#allocation2] ss:$8 sps:$4 sm:$0xff]  }
  0x2c   :  { %229 = vmatprep.mubr.bf16.mxu0 %v384_v11  ;;  %v378_v13 = vld [vmem:[#allocation5 + $0x70] sm:$0xff]   ;;  %v380_v15 = vld [vmem:[#allocation5 + $0x78] sm:$0xff]   ;;  %p440_p5 = por %p439_p4, %p438_p3 }
  0x2d   :  { %340 = vmatpush3.bf16.msra.mxu0 %v369_v3  ;;  %v379_v14 = vld [vmem:[#allocation5 + $0x30] sm:$0xff]   ;;  %v381_v16 = vld [vmem:[#allocation5 + $0x38] sm:$0xff]  }
  0x2e   :  { %341 = vmatprep.subr.bf16.mxu0 %v370_v4  ;;  %v307_v20 = vld [vmem:[%s551_s2] ss:$0 sm:$0xff]  ;;  %p441_p6 = pnand %p440_p5, %p434_p2 }
  0x2f   :  { %v326_v43 = vld [vmem:[%s552_s3] ss:$0 sm:$0xff] }
  0x30   :  { %v327_v47 = vld [vmem:[%s553_s4] ss:$0 sm:$0xff] }
  0x31   :  { %342 = vmatpush3.bf16.msra.mxu0 %v371_v5 }
  0x32   :  { %343 = vmatprep.subr.bf16.mxu0 %v372_v6 }
  0x35   :  { %344 = vmatpush3.bf16.msra.mxu0 %v373_v7 }
  0x36   :  { %345 = vmatprep.subr.bf16.mxu0 %v374_v8 }
  0x39   :  { %346 = vmatpush3.bf16.msra.mxu0 %v375_v9 }
  0x3a   :  { %347 = vmatprep.subr.bf16.mxu0 %v376_v10 }
  0x3d   :  { %348 = vmatpush3.bf16.msra.mxu0 %v377_v12 }
  0x3e   :  { %349 = vmatprep.subr.bf16.mxu0 %v378_v13 }
  0x41   :  { %350 = vmatpush3.bf16.msra.mxu0 %v379_v14 }
  0x42   :  { %351 = vmatprep.subr.bf16.mxu0 %v380_v15 }
  0x45   :  { %352 = vmatpush3.bf16.msra.mxu0 %v381_v16 }
  0x48   :  { %230 = vmatmul.mubr.bf16.vlgmr.msra.gmra.mrb[0].mxu0 %v382_v17 }
 0x11b   :  { %v353_v18 = vpop.f32.mrb[0].mxu0 }
 0x11c   :  { %v354_v19 = vpop.f32.mrb[1].mxu0 }
 0x11d   :  { %v355_v21 = vadd.f32 %v354_v19, %v353_v18  ;;  %v356_v22 = vpop.f32.mrb[2].mxu0 }
 0x11e   :  { %v357_v23 = vpop.f32.mrb[3].mxu0 }
 0x11f   :  { %v358_v24 = vadd.f32 %v357_v23, %v356_v22  ;;  %v232_v25 = vadd.f32 %v355_v21, %v307_v20 }
 0x121   :  { %238 = vadd.xlane.f32.xlu0 %v232_v25  ;;  %v235_v26 = vadd.f32 %v358_v24, %v307_v20 }
 0x125   :  { %240 = vadd.xlane.f32.xlu0 %v235_v26 }
 0x1ae   :  { %v239_v27 = vpop.xlane.xlu0 %238 }
 0x1af   :  { %v243_v28 = vmul.f32 0.0078125, %v239_v27 }
 0x1b1   :  { %v245_v29 = vsub.f32 %v232_v25, %v243_v28 }
 0x1b2   :  { %v241_v30 = vpop.xlane.xlu0 %240 }
 0x1b3   :  { %v244_v31 = vmul.f32 0.0078125, %v241_v30  ;;  %v247_v32 = vmul.f32 %v245_v29, %v245_v29 }
 0x1b5   :  { %v246_v33 = vsub.f32 %v235_v26, %v244_v31  ;;  %249 = vadd.xlane.f32.xlu1 %v247_v32 }
 0x1b7   :  { %v248_v34 = vmul.f32 %v246_v33, %v246_v33 }
 0x1b9   :  { %251 = vadd.xlane.f32.xlu1 %v248_v34 }
 0x242   :  { %v250_v35 = vpop.xlane.xlu1 %249 }
 0x243   :  { %v253_v36 = vmul.f32 0.0078125, %v250_v35 }
 0x245   :  { %v255_v37 = vadd.f32 1e-05, %v253_v36 }
 0x246   :  { %v252_v38 = vpop.xlane.xlu1 %251 }
 0x247   :  { %385 = vrsqrt.f32 %v255_v37  ;;  %v254_v39 = vmul.f32 0.0078125, %v252_v38 }
 0x249   :  { %v256_v40 = vadd.f32 1e-05, %v254_v39 }
 0x24b   :  { %387 = vrsqrt.f32 %v256_v40 }
 0x251   :  { %v386_v41 = vpop.eup %385 }
 0x252   :  { %v259_v42 = vmul.f32 %v386_v41, %v245_v29 }
 0x254   :  { %v268_v46 = vmul.f32 %v326_v43, %v259_v42 }
 0x255   :  { %v388_v44 = vpop.eup %387 }
 0x256   :  { %v260_v45 = vmul.f32 %v388_v44, %v246_v33  ;;  %v277_v49 = vadd.f32 %v327_v47, %v268_v46 }
 0x258   :  { %v269_v48 = vmul.f32 %v326_v43, %v260_v45 }
 0x25a   :  { %v278_v50 = vadd.f32 %v327_v47, %v269_v48 }
 0x25c   :  { %v335_v51 = vpack.c.bf16 %v278_v50, %v277_v49 }
 0x25e   :  { %336 = vst [vmem:[#allocation7] sm:$0xff] %v335_v51  }
 0x25f   :  { %444 = shalt.err (!%p441_p6)
}
 0x260   :  { %s445_s28 = scalar_lea.hbm %s554_s5, 128 }
 0x261   :  { %p446_p7 = scmp.ne.s32.totalorder %s554_s5, %s445_s28  ;;  %p449_p8 = scmp.lt.u32.totalorder %s445_s28, %s554_s5 }
 0x263   :  { %p451_p9 = pnand %p449_p8, %p446_p7 }
 0x265   :  { %454 = shalt.err (!%p451_p9)
}
 0x266   :  { %300 = dma.vmem_to_hbm [thread:$0]  %s295_s25, 128, %s554_s5, [#allocation4], %s465_s0, %s465_s0, %s466_s17  }
 0x267   :  { %459 = dma.done.wait [#allocation4], 128  }
 0x268   :  { %460 = vsyncadd [#allocation4], 4294967168 }
 0x269   :  { %304 = vsyncpa [#allocation3], 1 }
 0x26a   :  { %305 = vsyncpa [#allocation6], 1 }
 0x26b   :  { %306 = vsyncpa [#allocation4], 1 }

</bundles_post_ra>
